<compile_context>
chip_gen: v5e
topology: v5e:2x2
jax: 0.10.0
libtpu: 0.0.40
codegen_flags: <defaults>
</compile_context>

<pallas_src>
import functools

import numpy as np
import jax
import jax.numpy as jnp
from jax import lax
from jax.experimental import pallas as pl
from jax.experimental.pallas import tpu as pltpu

EPS = 1e-3


def noisenet_kernel(x_ref, w1_ref, b1_ref, w2_ref, b2_ref,
                    w3s_ref, b3s_ref, w3d_ref, b3d_ref, q_ref, *, n):
    B = x_ref.shape[0]

    # Encoder MLP (MXU matmuls, f32 accumulation).
    h = jnp.tanh(jnp.dot(x_ref[...], w1_ref[...],
                         preferred_element_type=jnp.float32) + b1_ref[...])
    h = jnp.tanh(jnp.dot(h, w2_ref[...],
                         preferred_element_type=jnp.float32) + b2_ref[...])

    # Head fused with the tril scatter: selectors were folded into the weights
    # in the wrapper, so two small MXU dots produce the strict-lower entries
    # (flattened row-major) and the diagonal pre-activations directly.
    l_flat = jnp.dot(h, w3s_ref[...],
                     preferred_element_type=jnp.float32) + b3s_ref[...]    # (B, n*n)
    diag_v = jnp.dot(h, w3d_ref[...],
                     preferred_element_type=jnp.float32) + b3d_ref[...]    # (B, n)
    diag_sp = jax.nn.softplus(diag_v) + EPS                                # (B, n)

    # Assemble L: strict-lower entries from l_flat, softplus'd diagonal.
    L = l_flat.reshape(B, n, n)
    row = lax.broadcasted_iota(jnp.int32, (n, n), 0)
    col = lax.broadcasted_iota(jnp.int32, (n, n), 1)
    L = jnp.where((row == col)[None, :, :], diag_sp[:, :, None], L)        # (B, n, n)

    # Q = L @ L^T per batch as a batched MXU contraction (no rank-4 temp,
    # no cross-lane reduce).
    q = jnp.einsum('bik,bjk->bij', L, L,
                   preferred_element_type=jnp.float32)                     # (B, n, n)

    # Lane-dense store.
    q_ref[...] = q.reshape(B, n * n)


def build_scatter_matrices(n):
    """S: (m, n*n) strict-lower scatter, D: (m, n) diagonal scatter.

    Ordering matches torch.tril_indices(n, n, 0): (0,0),(1,0),(1,1),(2,0),...
    """
    m = n * (n + 1) // 2
    S = np.zeros((m, n * n), np.float32)
    D = np.zeros((m, n), np.float32)
    k = 0
    for i in range(n):
        for j in range(i + 1):
            if i == j:
                D[k, i] = 1.0
            else:
                S[k, i * n + j] = 1.0
            k += 1
    return S, D


@functools.partial(jax.jit, static_argnames=("n",))
def noisenet_forward(x, w1, b1, w2, b2, w3, b3, *, n):
    B = x.shape[0]
    S_np, D_np = build_scatter_matrices(n)
    S = jnp.asarray(S_np)
    D = jnp.asarray(D_np)

    # Fold the head weights with the tril scatter (tiny wrapper-side matmuls,
    # done once per call / constant-folded across weights reuse under jit).
    w3s = w3 @ S          # (hid, n*n)
    b3s = b3 @ S          # (1,   n*n)
    w3d = w3 @ D          # (hid, n)
    b3d = b3 @ D          # (1,   n)

    q_flat = pl.pallas_call(
        functools.partial(noisenet_kernel, n=n),
        out_shape=jax.ShapeDtypeStruct((B, n * n), jnp.float32),
        in_specs=[pl.BlockSpec(memory_space=pltpu.MemorySpace.VMEM)] * 9,
        out_specs=pl.BlockSpec(memory_space=pltpu.MemorySpace.VMEM),
    )(x, w1, b1, w2, b2, w3s, b3s, w3d, b3d)

    return q_flat.reshape(B, n, n)


def reference_forward(x, w1, b1, w2, b2, w3, b3, n):
    """Pure numpy replica of NoiseNet.forward / triangular_param."""
    h = np.tanh(x @ w1 + b1)
    h = np.tanh(h @ w2 + b2)
    v = h @ w3 + b3
    B = x.shape[0]
    L = np.zeros((B, n, n), np.float32)
    il, jl = np.tril_indices(n)
    L[:, il, jl] = v
    d = np.arange(n)
    L[:, d, d] = np.log1p(np.exp(L[:, d, d])) + EPS
    return L @ np.transpose(L, (0, 2, 1))


if __name__ == "__main__":
    B, n, hid = 8, 4, 64
    m = n * (n + 1) // 2

    key = jax.random.PRNGKey(0)
    kx, k1, k2, k3, k4, k5, k6 = jax.random.split(key, 7)

    x = jax.random.normal(kx, (B, n), dtype=jnp.float32)
    # Deterministic synthetic parameters (Linear weights stored as (in, out)).
    w1 = jax.random.uniform(k1, (n, hid), jnp.float32, -0.3, 0.3)
    b1 = jax.random.uniform(k2, (1, hid), jnp.float32, -0.1, 0.1)
    w2 = jax.random.uniform(k3, (hid, hid), jnp.float32, -0.3, 0.3)
    b2 = jax.random.uniform(k4, (1, hid), jnp.float32, -0.1, 0.1)
    w3 = jax.random.uniform(k5, (hid, m), jnp.float32, -0.3, 0.3)
    b3 = jax.random.uniform(k6, (1, m), jnp.float32, -0.1, 0.1)

    q = noisenet_forward(x, w1, b1, w2, b2, w3, b3, n=n)
    q = jax.block_until_ready(q)

    q_ref = reference_forward(
        np.asarray(x), np.asarray(w1), np.asarray(b1), np.asarray(w2),
        np.asarray(b2), np.asarray(w3), np.asarray(b3), n)

    np.testing.assert_allclose(np.asarray(q), q_ref, rtol=1e-4, atol=1e-4)
    print("KERNEL_OK")
</pallas_src>

<mosaic_0001>
module attributes {stable_mosaic.version = 11 : i64} {
  func.func @noisenet_kernel(%arg0: memref<8x4xf32, #tpu.memory_space<vmem>>, %arg1: memref<4x64xf32, #tpu.memory_space<vmem>>, %arg2: memref<1x64xf32, #tpu.memory_space<vmem>>, %arg3: memref<64x64xf32, #tpu.memory_space<vmem>>, %arg4: memref<1x64xf32, #tpu.memory_space<vmem>>, %arg5: memref<64x16xf32, #tpu.memory_space<vmem>>, %arg6: memref<1x16xf32, #tpu.memory_space<vmem>>, %arg7: memref<64x4xf32, #tpu.memory_space<vmem>>, %arg8: memref<1x4xf32, #tpu.memory_space<vmem>>, %arg9: memref<8x16xf32, #tpu.memory_space<vmem>>) attributes {dimension_semantics = [], scalar_prefetch = 0 : i64, scratch_operands = 0 : i64, tpu.core_type = #tpu.core_type<tc>} {
    %c0 = arith.constant 0 : index
    %c0_0 = arith.constant 0 : index
    %0 = vector.load %arg0[%c0, %c0_0] : memref<8x4xf32, #tpu.memory_space<vmem>>, vector<8x4xf32>
    %c0_1 = arith.constant 0 : index
    %c0_2 = arith.constant 0 : index
    %1 = vector.load %arg1[%c0_1, %c0_2] : memref<4x64xf32, #tpu.memory_space<vmem>>, vector<4x64xf32>
    %cst = arith.constant dense<0.000000e+00> : vector<8x64xf32>
    %2 = tpu.matmul %0, %1, %cst {dimension_numbers = #tpu.dot_dimension_numbers<[1], [0], [0], [1], [0, 0, 1, 1], [], []>} : vector<8x4xf32>, vector<4x64xf32>, vector<8x64xf32> -> vector<8x64xf32>
    %c0_3 = arith.constant 0 : index
    %c0_4 = arith.constant 0 : index
    %3 = vector.load %arg2[%c0_3, %c0_4] : memref<1x64xf32, #tpu.memory_space<vmem>>, vector<1x64xf32>
    %4 = vector.broadcast %3 : vector<1x64xf32> to vector<8x64xf32>
    %5 = arith.addf %2, %4 : vector<8x64xf32>
    %6 = math.tanh %5 : vector<8x64xf32>
    %c0_5 = arith.constant 0 : index
    %c0_6 = arith.constant 0 : index
    %7 = vector.load %arg3[%c0_5, %c0_6] : memref<64x64xf32, #tpu.memory_space<vmem>>, vector<64x64xf32>
    %cst_7 = arith.constant dense<0.000000e+00> : vector<8x64xf32>
    %8 = tpu.matmul %6, %7, %cst_7 {dimension_numbers = #tpu.dot_dimension_numbers<[1], [0], [0], [1], [0, 0, 1, 1], [], []>} : vector<8x64xf32>, vector<64x64xf32>, vector<8x64xf32> -> vector<8x64xf32>
    %c0_8 = arith.constant 0 : index
    %c0_9 = arith.constant 0 : index
    %9 = vector.load %arg4[%c0_8, %c0_9] : memref<1x64xf32, #tpu.memory_space<vmem>>, vector<1x64xf32>
    %10 = vector.broadcast %9 : vector<1x64xf32> to vector<8x64xf32>
    %11 = arith.addf %8, %10 : vector<8x64xf32>
    %12 = math.tanh %11 : vector<8x64xf32>
    %c0_10 = arith.constant 0 : index
    %c0_11 = arith.constant 0 : index
    %13 = vector.load %arg5[%c0_10, %c0_11] : memref<64x16xf32, #tpu.memory_space<vmem>>, vector<64x16xf32>
    %cst_12 = arith.constant dense<0.000000e+00> : vector<8x16xf32>
    %14 = tpu.matmul %12, %13, %cst_12 {dimension_numbers = #tpu.dot_dimension_numbers<[1], [0], [0], [1], [0, 0, 1, 1], [], []>} : vector<8x64xf32>, vector<64x16xf32>, vector<8x16xf32> -> vector<8x16xf32>
    %c0_13 = arith.constant 0 : index
    %c0_14 = arith.constant 0 : index
    %15 = vector.load %arg6[%c0_13, %c0_14] : memref<1x16xf32, #tpu.memory_space<vmem>>, vector<1x16xf32>
    %16 = vector.broadcast %15 : vector<1x16xf32> to vector<8x16xf32>
    %17 = arith.addf %14, %16 : vector<8x16xf32>
    %c0_15 = arith.constant 0 : index
    %c0_16 = arith.constant 0 : index
    %18 = vector.load %arg7[%c0_15, %c0_16] : memref<64x4xf32, #tpu.memory_space<vmem>>, vector<64x4xf32>
    %cst_17 = arith.constant dense<0.000000e+00> : vector<8x4xf32>
    %19 = tpu.matmul %12, %18, %cst_17 {dimension_numbers = #tpu.dot_dimension_numbers<[1], [0], [0], [1], [0, 0, 1, 1], [], []>} : vector<8x64xf32>, vector<64x4xf32>, vector<8x4xf32> -> vector<8x4xf32>
    %c0_18 = arith.constant 0 : index
    %c0_19 = arith.constant 0 : index
    %20 = vector.load %arg8[%c0_18, %c0_19] : memref<1x4xf32, #tpu.memory_space<vmem>>, vector<1x4xf32>
    %21 = vector.broadcast %20 : vector<1x4xf32> to vector<8x4xf32>
    %22 = arith.addf %19, %21 : vector<8x4xf32>
    %cst_20 = arith.constant 0.000000e+00 : f32
    %23 = vector.broadcast %cst_20 : f32 to vector<8x4xf32>
    %24 = arith.maximumf %22, %23 : vector<8x4xf32>
    %25 = vector.broadcast %cst_20 : f32 to vector<8x4xf32>
    %26 = arith.subf %22, %25 : vector<8x4xf32>
    %27 = arith.cmpf one, %26, %26 : vector<8x4xf32>
    %28 = vector.broadcast %cst_20 : f32 to vector<8x4xf32>
    %29 = arith.addf %22, %28 : vector<8x4xf32>
    %30 = math.absf %26 : vector<8x4xf32>
    %cst_21 = arith.constant 0.000000e+00 : f32
    %31 = vector.broadcast %cst_21 : f32 to vector<8x4xf32>
    %32 = arith.subf %31, %30 : vector<8x4xf32>
    %33 = math.exp %32 : vector<8x4xf32>
    %34 = math.log1p %33 : vector<8x4xf32>
    %35 = arith.addf %24, %34 : vector<8x4xf32>
    %36 = arith.select %27, %29, %35 : vector<8x4xi1>, vector<8x4xf32>
    %cst_22 = arith.constant 1.000000e-03 : f32
    %37 = vector.broadcast %cst_22 : f32 to vector<8x4xf32>
    %38 = arith.addf %36, %37 : vector<8x4xf32>
    %39 = vector.shape_cast %17 : vector<8x16xf32> to vector<8x4x4xf32>
    %40 = tpu.iota {dimensions = array<i32: 0>} : vector<4x4xi32>
    %41 = tpu.iota {dimensions = array<i32: 1>} : vector<4x4xi32>
    %42 = arith.cmpi eq, %40, %41 : vector<4x4xi32>
    %43 = vector.shape_cast %42 : vector<4x4xi1> to vector<1x4x4xi1>
    %44 = vector.shape_cast %38 : vector<8x4xf32> to vector<8x4x1xf32>
    %45 = vector.shape_cast %43 : vector<1x4x4xi1> to vector<1x4x4xi1>
    %46 = vector.broadcast %45 : vector<1x4x4xi1> to vector<8x4x4xi1>
    %47 = vector.shape_cast %44 : vector<8x4x1xf32> to vector<8x4x1xf32>
    %48 = vector.broadcast %47 : vector<8x4x1xf32> to vector<8x4x4xf32>
    %49 = arith.select %46, %48, %39 : vector<8x4x4xi1>, vector<8x4x4xf32>
    "tpu.trace_start"() <{level = 10 : i32, message = "bik,bjk->bij"}> : () -> ()
    %cst_23 = arith.constant dense<0.000000e+00> : vector<8x4x4xf32>
    %50 = tpu.matmul %49, %49, %cst_23 {dimension_numbers = #tpu.dot_dimension_numbers<[2], [2], [1], [1], [0, 0, 0, 1, 1, 1], [0], [0]>} : vector<8x4x4xf32>, vector<8x4x4xf32>, vector<8x4x4xf32> -> vector<8x4x4xf32>
    "tpu.trace_stop"() : () -> ()
    %51 = vector.shape_cast %50 : vector<8x4x4xf32> to vector<8x16xf32>
    %c0_24 = arith.constant 0 : index
    %c0_25 = arith.constant 0 : index
    %52 = vector.load %arg9[%c0_24, %c0_25] : memref<8x16xf32, #tpu.memory_space<vmem>>, vector<8x16xf32>
    tpu.vector_store %arg9[%c0_24, %c0_25], %51 {strides = array<i32>} : memref<8x16xf32, #tpu.memory_space<vmem>>, vector<8x16xf32>,
    return
  }
}

</mosaic_0001>

<bundles_post_ra>
// kernel: noisenet_forward.1
= control target key start
LH: loop header
LB: loop body
LE: loop exit
PB: predicated region body
PF: predicated region fallthrough
CT: control target
= control target key end

     0   :  { %vm42_vm0 = vcmask 1043456   ;;  %vm38_vm1 = vcmask 31744   ;;  %vm79_vm2 = vcmask 523264   ;;  %v257_v34 = vlaneseq  ;;  %s636_s18 = smov 120   ;;  %s878_s1 = inlined_call_operand.vmem [shape: f32[4,64], index: 1, kind: input, shape index: {}]   ;;  %s879_s0 = inlined_call_operand.vmem [shape: f32[8,4], index: 0, kind: input, shape index: {}]   ;;  %s880_s3 = inlined_call_operand.vmem [shape: f32[64,64], index: 3, kind: input, shape index: {}]   ;;  %s881_s2 = inlined_call_operand.vmem [shape: f32[1,64], index: 2, kind: input, shape index: {}]   ;;  %s882_s4 = inlined_call_operand.vmem [shape: f32[1,64], index: 4, kind: input, shape index: {}]   ;;  %s883_s5 = inlined_call_operand.vmem [shape: f32[64,16], index: 5, kind: input, shape index: {}]   ;;  %s884_s7 = inlined_call_operand.vmem [shape: f32[64,4], index: 7, kind: input, shape index: {}]   ;;  %s885_s6 = inlined_call_operand.vmem [shape: f32[1,16], index: 6, kind: input, shape index: {}]   ;;  %s886_s8 = inlined_call_operand.vmem [shape: f32[1,4], index: 8, kind: input, shape index: {}]   ;;  %s887_s9 = inlined_call_operand.vmem [shape: f32[8,16], index: 9, kind: output, shape index: {}]  }
   0x1   :  { %v33_v0 = vld [vmem:[%s878_s1] sm:$0xf]  ;;  %v74_v2 = vld [vmem:[%s880_s3 + $0x38] sm:$0xff]  ;;  %v73_v3 = vld [vmem:[%s880_s3 + $0x30] sm:$0xff]  ;;  %vm201_vm6 = vcmask 1047556   ;;  %s641_s1 = smov 12  }
   0x2   :  { %v32_v1 = vld [vmem:[%s879_s0] sm:$0xff]  ;;  %591 = vmatpush.msk.msra.mxu0 %vm42_vm0, %v33_v0  ;;  %91 = vmatpush.msra.mxu1 %v74_v2  ;;  %v72_v4 = vld [vmem:[%s880_s3 + $0x28] sm:$0xff]  ;;  %v70_v6 = vld [vmem:[%s880_s3 + $0x18] sm:$0xff]  ;;  %v258_v35 = vshrl.u32 %v257_v34, 7  ;;  %v260_v38 = vand.u32 127, %v257_v34  ;;  %s642_s0 = smov 8  }
   0x3   :  { %592 = vmatmul.msk.f32.vlgmr.msra.gmra.mxu0 %vm38_vm1, %v32_v1  ;;  %v71_v5 = vld [vmem:[%s880_s3 + $0x20] sm:$0xff]  ;;  %v69_v7 = vld [vmem:[%s880_s3 + $0x10] sm:$0xff]  ;;  %v68_v8 = vld [vmem:[%s880_s3 + $0x8] sm:$0xff]  ;;  %vm581_vm7 = vcmask 64512   ;;  %vm583_vm8 = vcmask 97280   ;;  %vm585_vm9 = vcmask 130048  }
   0x4   :  { %92 = vmatpush.msra.mxu1 %v73_v3  ;;  %v67_v9 = vld [vmem:[%s880_s3] sm:$0xff]  ;;  %v111_v10 = vld [vmem:[%s883_s5 + $0x38] sm:$0xff]  ;;  %v110_v12 = vld [vmem:[%s883_s5 + $0x30] sm:$0xff]  ;;  %622 = vset.pattern.permute.xlu0 %v258_v35  ;;  %vm789_vm3 = vcmp.eq.s32.totalorder %v258_v35, %v260_v38 }
   0x5   :  { %v146_v11 = vld [vmem:[%s884_s7 + $0x38] sm:$0xff]  ;;  %127 = vmatpush.msra.mxu2 %v111_v10  ;;  %v145_v13 = vld [vmem:[%s884_s7 + $0x30] sm:$0xff]  ;;  %v109_v14 = vld [vmem:[%s883_s5 + $0x28] sm:$0xff]  ;;  %621 = vset.pattern.permute.xlu2 %v258_v35 }
   0x6   :  { %93 = vmatpush.msra.mxu1 %v72_v4  ;;  %159 = vmatpush.msra.mxu3 %v146_v11  ;;  %v144_v15 = vld [vmem:[%s884_s7 + $0x28] sm:$0xff]  ;;  %v623_v16 = vld [vmem:[%s881_s2] ss:$0 sm:$0xff]  ;;  %v107_v22 = vld [vmem:[%s883_s5 + $0x18] sm:$0xff] }
   0x7   :  { %128 = vmatpush.msra.mxu2 %v110_v12  ;;  %v108_v20 = vld [vmem:[%s883_s5 + $0x20] sm:$0xff]  ;;  %v142_v23 = vld [vmem:[%s884_s7 + $0x18] sm:$0xff]  ;;  %v106_v24 = vld [vmem:[%s883_s5 + $0x10] sm:$0xff]  ;;  %620 = vset.pattern.permute.xlu1 %v258_v35 }
   0x8   :  { %94 = vmatpush.msra.mxu1 %v71_v5  ;;  %160 = vmatpush.msra.mxu3 %v145_v13  ;;  %v143_v21 = vld [vmem:[%s884_s7 + $0x20] sm:$0xff]  ;;  %v141_v25 = vld [vmem:[%s884_s7 + $0x10] sm:$0xff]  ;;  %v105_v26 = vld [vmem:[%s883_s5 + $0x8] sm:$0xff] }
   0x9   :  { %129 = vmatpush.msra.mxu2 %v109_v14  ;;  %v140_v27 = vld [vmem:[%s884_s7 + $0x8] sm:$0xff]  ;;  %v104_v28 = vld [vmem:[%s883_s5] sm:$0xff] }
   0xa   :  { %95 = vmatpush.msra.mxu1 %v70_v6  ;;  %161 = vmatpush.msra.mxu3 %v144_v15  ;;  %v139_v29 = vld [vmem:[%s884_s7] sm:$0xff]  ;;  %v638_v6 = vmov 1983009808  }
   0xb   :  { %130 = vmatpush.msra.mxu2 %v108_v20  ;;  %v624_v30 = vld [vmem:[%s882_s4] ss:$0 sm:$0xff]  ;;  %s635_s4 = smov 124  }
   0xc   :  { %96 = vmatpush.msra.mxu1 %v69_v7  ;;  %162 = vmatpush.msra.mxu3 %v143_v21  ;;  %v625_v36 = vld [vmem:[%s885_s6] ss:$0 sm:$0xff]  ;;  %s637_s6 = smov 116   ;;  %v206_v7 = vunpack.c.l.s4 %v638_v6 }
   0xd   :  { %131 = vmatpush.msra.mxu2 %v107_v22  ;;  %v626_v37 = vld [vmem:[%s886_s8] ss:$0 sm:$0xff]  ;;  %s640_s8 = smov 4  }
   0xe   :  { %97 = vmatpush.msra.mxu1 %v68_v8  ;;  %163 = vmatpush.msra.mxu3 %v142_v23  ;;  %v798_v10 = vunpack.c.0.s8 %v206_v7 }
   0xf   :  { %132 = vmatpush.msra.mxu2 %v106_v24 }
  0x10   :  { %98 = vmatpush.msra.mxu1 %v67_v9  ;;  %164 = vmatpush.msra.mxu3 %v141_v25 }
  0x11   :  { %133 = vmatpush.msra.mxu2 %v105_v26 }
  0x12   :  { %165 = vmatpush.msra.mxu3 %v140_v27 }
  0x13   :  { %134 = vmatpush.msra.mxu2 %v104_v28 }
  0x14   :  { %166 = vmatpush.msra.mxu3 %v139_v29 }
  0x80   :  { %v63_v17 = vpop.f32.mrf.mxu0 }
  0x81   :  { %v64_v18 = vadd.f32 %v623_v16, %v63_v17  ;;  %v639_v17 = vmov 1934713408  }
  0x83   :  { %627 = vtanh.f32 %v64_v18  ;;  %v230_v18 = vunpack.c.l.s4 %v639_v17 }
  0x85   :  { %v806_v24 = vunpack.c.0.s8 %v230_v18 }
  0x89   :  { %v628_v19 = vpop.eup %627 }
  0x8a   :  { %593 = vmatmul.msk.f32.vlgmr.msra.gmra.mxu1 %vm79_vm2, %v628_v19 }
 0x107   :  { %v100_v31 = vpop.f32.mrf.mxu1 }
 0x108   :  { %v101_v32 = vadd.f32 %v624_v30, %v100_v31 }
 0x10a   :  { %629 = vtanh.f32 %v101_v32 }
 0x110   :  { %v630_v33 = vpop.eup %629 }
 0x111   :  { %594 = vmatmul.msk.f32.vlgmr.msra.gmra.mxu2 %vm79_vm2, %v630_v33  ;;  %595 = vmatmul.msk.f32.vlgmr.msra.gmra.mxu3 %vm79_vm2, %v630_v33 }
 0x194   :  { %v136_v39 = vpop.f32.mrf.mxu2  ;;  %v168_v40 = vpop.f32.mrf.mxu3 }
 0x195   :  { %v787_v41 = vadd.f32 %v625_v36, %v136_v39  ;;  %v169_v42 = vadd.f32 %v626_v37, %v168_v40 }
 0x197   :  { %v174_v44 = vand.u32 2147483647, %v169_v42  ;;  %191 = vrot.lane.b32.xlu1 %v787_v41, %s635_s4  ;;  %194 = vrot.lane.b32.xlu0 %v787_v41, %s636_s18  ;;  %v171_v55 = vmax.f32 %v169_v42, 0.0  ;;  %vm172_vm5 = vcmp.ne.f32.partialorder %v169_v42, %v169_v42  ;;  %v203_v23 = vrot.slane %v787_v41, 4 }
 0x199   :  { %v175_v45 = vsub.f32 0.0, %v174_v44 }
 0x19b   :  { %v176_v46 = vmul.f32 1.442695, %v175_v45 }
 0x19d   :  { %631 = vpow2.f32 %v176_v46 }
 0x19f   :  { %197 = vrot.lane.b32.xlu0 %v787_v41, %s637_s6 }
 0x1a3   :  { %v632_v47 = vpop.eup %631 }
 0x1a4   :  { %v178_v48 = vadd.f32 1.0, %v632_v47  ;;  %v181_v49 = vmul.f32 -0.5, %v632_v47  ;;  %v184_v51 = vand.u32 2147483647, %v632_v47 }
 0x1a6   :  { %633 = vlog2.f32 %v178_v48  ;;  %v182_v50 = vadd.f32 1.0, %v181_v49  ;;  %vm185_vm4 = vcmp.lt.f32.partialorder %v184_v51, 0.0004427343 }
 0x1a8   :  { %v183_v54 = vmul.f32 %v632_v47, %v182_v50 }
 0x1ac   :  { %v634_v52 = vpop.eup %633 }
 0x1ad   :  { %v180_v53 = vmul.f32 0.6931472, %v634_v52 }
 0x1af   :  { %v186_v56 = vsel %vm185_vm4, %v183_v54, %v180_v53 }
 0x1b0   :  { %v187_v57 = vadd.f32 %v186_v56, %v171_v55 }
 0x1b2   :  { %v188_v58 = vsel %vm172_vm5, %v169_v42, %v187_v57 }
 0x1b3   :  { %v189_v59 = vadd.f32 0.001, %v188_v58 }
 0x1b5   :  { %v283_v60 = vperm.slane %v189_v59, 3  ;;  %v262_v61 = vperm.slane %v189_v59, 0  ;;  %v269_v62 = vperm.slane %v189_v59, 1  ;;  %v276_v63 = vperm.slane %v189_v59, 2 }
 0x1b6   :  { %v311_v0 = vperm.slane %v189_v59, 7  ;;  %v290_v1 = vperm.slane %v189_v59, 4  ;;  %v304_v2 = vperm.slane %v189_v59, 6  ;;  %v297_v3 = vperm.slane %v189_v59, 5 }
 0x1b7   :  { %288 = vperm.xlu2 %621, %v283_v60   ;;  %267 = vperm.xlu1 %620, %v262_v61  }
 0x1b8   :  { %274 = vperm.xlu0 %622, %v269_v62  }
 0x1bf   :  { %281 = vperm.xlu2 %621, %v276_v63   ;;  %316 = vperm.xlu1 %620, %v311_v0  }
 0x1c7   :  { %295 = vperm.xlu2 %621, %v290_v1   ;;  %309 = vperm.xlu1 %620, %v304_v2  }
 0x1cf   :  { %302 = vperm.xlu2 %621, %v297_v3  }
 0x209   :  { %v195_v4 = vpop.permute.xlu0 %194  ;;  %v192_v8 = vpop.permute.xlu1 %191 }
 0x20a   :  { %v200_v5 = vrot.slane %v195_v4, 4  ;;  %v215_v11 = vrot.slane %v192_v8, 4  ;;  %v204_v26 = vsel %vm201_vm6, %v195_v4, %v203_v23 }
 0x20b   :  { %v212_v32 = vperm.slane %v204_v26, %v798_v10 }
 0x20c   :  { %v202_v9 = vsel %vm201_vm6, %v200_v5, %v787_v41 }
 0x20d   :  { %v208_v12 = vperm.slane %v202_v9, %v798_v10  ;;  %v239_v42 = vrot.slane %v212_v32, 4 }
 0x20f   :  { %v227_v20 = vrot.slane %v208_v12, 4 }
 0x211   :  { %v289_v13 = vpop.permute.xlu2 %288  ;;  %v198_v14 = vpop.permute.xlu0 %197 }
 0x212   :  { %v213_v15 = vrot.slane %v198_v14, 4  ;;  %v216_v16 = vsel %vm201_vm6, %v198_v14, %v215_v11 }
 0x213   :  { %v224_v22 = vperm.slane %v216_v16, %v798_v10 }
 0x214   :  { %v214_v19 = vsel %vm201_vm6, %v213_v15, %v192_v8 }
 0x215   :  { %v220_v21 = vperm.slane %v214_v19, %v798_v10  ;;  %v237_v28 = vrot.slane %v224_v22, 4  ;;  %v240_v44 = vsel %vm201_vm6, %v224_v22, %v239_v42 }
 0x216   :  { %v248_v48 = vperm.slane %v240_v44, %v806_v24 }
 0x217   :  { %v228_v25 = vsel %vm201_vm6, %v220_v21, %v227_v20  ;;  %v225_v33 = vrot.slane %v220_v21, 4  ;;  %v238_v36 = vsel %vm201_vm6, %v237_v28, %v212_v32 }
 0x218   :  { %v236_v27 = vperm.slane %v228_v25, %v806_v24  ;;  %v244_v38 = vperm.slane %v238_v36, %v806_v24  ;;  %v255_v55 = vrot.slane %v248_v48, 4 }
 0x219   :  { %v282_v29 = vpop.permute.xlu2 %281  ;;  %v226_v37 = vsel %vm201_vm6, %v225_v33, %v208_v12 }
 0x21a   :  { %v322_v30 = vsel %vm789_vm3, %v282_v29, %v236_v27  ;;  %v251_v31 = vrot.slane %v236_v27, 4  ;;  %v232_v41 = vperm.slane %v226_v37, %v806_v24  ;;  %v253_v46 = vrot.slane %v244_v38, 4 }
 0x21b   :  { %600 = vmatpush.xpose.msk.msrb.mxu1 %vm38_vm1, %v322_v30  ;;  %v256_v58 = vsel %vm201_vm6, 0.0, %v255_v55 }
 0x21c   :  { %v252_v34 = vsel %vm201_vm6, 0.0, %v251_v31  ;;  %v249_v45 = vrot.slane %v232_v41, 4  ;;  %v254_v54 = vsel %vm201_vm6, 0.0, %v253_v46 }
 0x21d   :  { %v323_v35 = vsel %vm789_vm3, %v289_v13, %v252_v34 }
 0x21e   :  { %601 = vmatmul.msk.f32.vlgmr.msrb.gmra.mxu1 %vm38_vm1, %v322_v30  ;;  %602 = vmatpush.xpose.msk.msrb.mxu2 %vm38_vm1, %v323_v35  ;;  %v250_v49 = vsel %vm201_vm6, 0.0, %v249_v45 }
 0x221   :  { %v296_v39 = vpop.permute.xlu2 %295  ;;  %603 = vmatmul.msk.f32.vlgmr.msrb.gmra.mxu2 %vm38_vm1, %v323_v35 }
 0x222   :  { %v324_v40 = vsel %vm789_vm3, %v296_v39, %v244_v38 }
 0x223   :  { %604 = vmatpush.xpose.msk.msrb.mxu3 %vm38_vm1, %v324_v40 }
 0x226   :  { %605 = vmatmul.msk.f32.vlgmr.msrb.gmra.mxu3 %vm38_vm1, %v324_v40 }
 0x229   :  { %v268_v47 = vpop.permute.xlu1 %267  ;;  %v303_v52 = vpop.permute.xlu2 %302 }
 0x22a   :  { %v275_v50 = vpop.permute.xlu0 %274  ;;  %v320_v51 = vsel %vm789_vm3, %v268_v47, %v232_v41  ;;  %v325_v56 = vsel %vm789_vm3, %v303_v52, %v254_v54 }
 0x22b   :  { %v321_v53 = vsel %vm789_vm3, %v275_v50, %v250_v49  ;;  %596 = vmatpush.xpose.msk.msrb.mxu0 %vm38_vm1, %v320_v51 }
 0x22e   :  { %597 = vmatmul.msk.f32.vlgmr.msrb.gmra.mxu0 %vm38_vm1, %v320_v51 }
 0x22f   :  { %598 = vmatpush.xpose.msk.msra.mxu0 %vm38_vm1, %v321_v53 }
 0x231   :  { %v317_v57 = vpop.permute.xlu1 %316 }
 0x232   :  { %v327_v59 = vsel %vm789_vm3, %v317_v57, %v256_v58 }
 0x233   :  { %606 = vmatpush.xpose.msk.msrb.mxu0 %vm38_vm1, %v325_v56  ;;  %610 = vmatpush.xpose.msk.msra.mxu2 %vm38_vm1, %v327_v59 }
 0x236   :  { %599 = vmatmul.msk.f32.vlgmr.msra.gmra.mxu0 %vm38_vm1, %v321_v53  ;;  %611 = vmatmul.msk.f32.vlgmr.msra.gmra.mxu2 %vm38_vm1, %v327_v59 }
 0x239   :  { %v310_v60 = vpop.permute.xlu1 %309 }
 0x23a   :  { %v326_v61 = vsel %vm789_vm3, %v310_v60, %v248_v48 }
 0x23b   :  { %608 = vmatpush.xpose.msk.msra.mxu1 %vm38_vm1, %v326_v61 }
 0x23e   :  { %607 = vmatmul.msk.f32.vlgmr.msrb.gmra.mxu0 %vm38_vm1, %v325_v56  ;;  %609 = vmatmul.msk.f32.vlgmr.msra.gmra.mxu1 %vm38_vm1, %v326_v61 }
 0x29b   :  { %v394_v63 = vpop.f32.mrf.mxu1 }
 0x29c   :  { %v512_v1 = vrot.slane %v394_v63, 4 }
 0x2a4   :  { %v417_v0 = vpop.f32.mrf.mxu2 }
 0x2a5   :  { %v518_v2 = vrot.slane %v417_v0, 4 }
 0x2a9   :  { %v440_v17 = vpop.f32.mrf.mxu3 }
 0x2ab   :  { %v348_v62 = vpop.f32.mrf.mxu0 }
 0x2ac   :  { %v513_v4 = vsel %vm201_vm6, %v512_v1, %v348_v62 }
 0x2ad   :  { %v517_v43 = vperm.slane %v513_v4, %v798_v10 }
 0x2af   :  { %v538_v11 = vrot.slane %v517_v43, 4 }
 0x2b3   :  { %v371_v3 = vpop.f32.mrf.mxu0 }
 0x2b4   :  { %v519_v5 = vsel %vm201_vm6, %v518_v2, %v371_v3 }
 0x2b5   :  { %v523_v6 = vperm.slane %v519_v5, %v798_v10 }
 0x2b7   :  { %v536_v7 = vrot.slane %v523_v6, 4  ;;  %v539_v18 = vsel %vm201_vm6, %v523_v6, %v538_v11 }
 0x2b8   :  { %v547_v25 = vperm.slane %v539_v18, %v806_v24 }
 0x2b9   :  { %v509_v8 = vpop.f32.mrf.mxu2  ;;  %v537_v14 = vsel %vm201_vm6, %v536_v7, %v517_v43 }
 0x2ba   :  { %v530_v9 = vrot.slane %v509_v8, 4  ;;  %v543_v21 = vperm.slane %v537_v14, %v806_v24  ;;  %v566_v34 = vrot.slane %v547_v25, 4 }
 0x2bb   :  { %v463_v12 = vpop.f32.mrf.mxu0  ;;  %v486_v13 = vpop.f32.mrf.mxu1 }
 0x2bc   :  { %v531_v15 = vsel %vm201_vm6, %v530_v9, %v463_v12  ;;  %v524_v16 = vrot.slane %v486_v13, 4  ;;  %v562_v29 = vrot.slane %v543_v21, 4 }
 0x2bd   :  { %v535_v19 = vperm.slane %v531_v15, %v798_v10 }
 0x2be   :  { %v525_v20 = vsel %vm201_vm6, %v524_v16, %v440_v17 }
 0x2bf   :  { %v548_v22 = vrot.slane %v535_v19, 4  ;;  %v529_v23 = vperm.slane %v525_v20, %v798_v10 }
 0x2c1   :  { %v550_v26 = vrot.slane %v529_v23, 4  ;;  %v549_v27 = vsel %vm201_vm6, %v548_v22, %v529_v23 }
 0x2c2   :  { %v555_v28 = vperm.slane %v549_v27, %v806_v24 }
 0x2c3   :  { %v551_v30 = vsel %vm201_vm6, %v535_v19, %v550_v26 }
 0x2c4   :  { %v563_v31 = vsel %vm201_vm6, %v555_v28, %v562_v29  ;;  %v560_v32 = vrot.slane %v555_v28, 4  ;;  %v559_v33 = vperm.slane %v551_v30, %v806_v24 }
 0x2c5   :  { %569 = vrot.lane.b32.xlu0 %v563_v31, %s640_s8 }
 0x2c6   :  { %v567_v10 = vsel %vm201_vm6, %v559_v33, %v566_v34  ;;  %v564_v35 = vrot.slane %v559_v33, 4  ;;  %v561_v36 = vsel %vm201_vm6, %v560_v32, %v543_v21 }
 0x2c7   :  { %577 = vrot.lane.b32.xlu2 %v567_v10, %s641_s1 }
 0x2c8   :  { %v565_v37 = vsel %vm201_vm6, %v564_v35, %v547_v25 }
 0x2c9   :  { %573 = vrot.lane.b32.xlu1 %v565_v37, %s642_s0 }
 0x321   :  { %v578_v40 = vpop.permute.xlu2 %577 }
 0x337   :  { %v570_v38 = vpop.permute.xlu0 %569 }
 0x338   :  { %v580_v39 = vsel %vm38_vm1, %v561_v36, %v570_v38 }
 0x33b   :  { %v574_v24 = vpop.permute.xlu1 %573 }
 0x33c   :  { %v582_v41 = vsel %vm581_vm7, %v580_v39, %v574_v24 }
 0x33d   :  { %v584_v42 = vsel %vm583_vm8, %v582_v41, %v578_v40 }
 0x33e   :  { %586 = vst.msk [vmem:[%s887_s9] sm:$0xff] %vm585_vm9, %v584_v42 }

</bundles_post_ra>
